<compile_context>
chip_gen: v5e
topology: v5e:2x2
jax: 0.10.0
libtpu: 0.0.40
codegen_flags: <defaults>
</compile_context>

<pallas_src>
import functools
import math

import jax
import jax.numpy as jnp
from jax.experimental import pallas as pl
from jax.experimental.pallas import tpu as pltpu

_SQRT_HALF = 1.0 / math.sqrt(2.0)


def _gelu_exact(x):
    # torch.nn.GELU() default: 0.5 * x * (1 + erf(x / sqrt(2)))
    return 0.5 * x * (1.0 + jax.lax.erf(x * _SQRT_HALF))


def _round_up(x, m):
    return (x + m - 1) // m * m


def _pick_tile(total, desired, align):
    """Largest multiple of `align` that divides `total` and is <= `desired`,
    else `total` (fully resident)."""
    if total <= desired:
        return total
    t = (desired // align) * align
    while t >= align:
        if total % t == 0:
            return t
        t -= align
    return total


def _ffn_kernel(*refs, glu):
    if glu:
        (x_ref, w1v_ref, b1v_ref, w1g_ref, b1g_ref,
         w2_ref, b2_ref, o_ref, acc_ref) = refs
    else:
        (x_ref, w1_ref, b1_ref, w2_ref, b2_ref, o_ref, acc_ref) = refs

    j = pl.program_id(1)

    @pl.when(j == 0)
    def _():
        acc_ref[...] = jnp.zeros_like(acc_ref)

    x = x_ref[...]                      # native dtype -> MXU, f32 accumulation
    if glu:
        hv = jnp.dot(x, w1v_ref[...], preferred_element_type=jnp.float32)
        hv = hv + b1v_ref[...].astype(jnp.float32)
        hg = jnp.dot(x, w1g_ref[...], preferred_element_type=jnp.float32)
        hg = hg + b1g_ref[...].astype(jnp.float32)
        h = hv * _gelu_exact(hg)        # (tm, tn) in f32
    else:
        h = jnp.dot(x, w1_ref[...], preferred_element_type=jnp.float32)
        h = _gelu_exact(h + b1_ref[...].astype(jnp.float32))

    # TODO(synk): Dropout(p=0.0) is the identity in eval mode; omitted.
    acc_ref[...] += jnp.dot(h.astype(w2_ref.dtype), w2_ref[...],
                            preferred_element_type=jnp.float32)

    @pl.when(j == pl.num_programs(1) - 1)
    def _():
        o_ref[...] = (acc_ref[...]
                      + b2_ref[...].astype(jnp.float32)).astype(o_ref.dtype)


def feed_forward(x, params, *, glu=False, tm=256, tn=512):
    """x: [batch, seq, dim] -> [batch, seq, dim_out]."""
    w1, b1, w2, b2 = params
    B, S, dim = x.shape
    inner, dim_out = w2.shape
    proj_out = w1.shape[1]
    assert proj_out == (2 * inner if glu else inner)

    M = B * S
    x2d = x.reshape(M, dim)
    xbytes = x.dtype.itemsize
    wbytes = w1.dtype.itemsize

    # --- row tiling (pad M instead of asserting divisibility) ---
    tm_eff = min(tm, _round_up(M, 8))
    M_pad = _round_up(M, tm_eff)
    if M_pad != M:
        x2d = jnp.pad(x2d, ((0, M_pad - M), (0, 0)))

    # --- inner-dim (reduction) tiling ---
    tn_eff = _pick_tile(inner, tn, 128)

    # --- lane-dense output: pad dim_out to a multiple of 128 ---
    dop = _round_up(dim_out, 128)
    if dop != dim_out:
        w2 = jnp.pad(w2, ((0, 0), (0, dop - dim_out)))
        b2 = jnp.pad(b2, ((0, 0), (0, dop - dim_out)))

    if glu:
        w1v, w1g = w1[:, :inner], w1[:, inner:]
        b1v, b1g = b1[:, :inner], b1[:, inner:]
        proj_args = (w1v, b1v, w1g, b1g)
        proj_specs = [
            pl.BlockSpec((dim, tn_eff), lambda i, j: (0, j)),
            pl.BlockSpec((1, tn_eff), lambda i, j: (0, j)),
            pl.BlockSpec((dim, tn_eff), lambda i, j: (0, j)),
            pl.BlockSpec((1, tn_eff), lambda i, j: (0, j)),
        ]
    else:
        proj_args = (w1, b1)
        proj_specs = [
            pl.BlockSpec((dim, tn_eff), lambda i, j: (0, j)),
            pl.BlockSpec((1, tn_eff), lambda i, j: (0, j)),
        ]

    grid = (M_pad // tm_eff, inner // tn_eff)

    # --- rough VMEM budget (double-buffered tiles + f32 accumulator) ---
    n_w1 = 2 if glu else 1
    vmem_est = (2 * tm_eff * dim * xbytes
                + 2 * n_w1 * (dim + 1) * tn_eff * wbytes
                + 2 * (tn_eff + 1) * dop * wbytes
                + 2 * tm_eff * dop * xbytes
                + tm_eff * dop * 4)
    vmem_limit = int(min(96 * 1024 * 1024,
                         max(32 * 1024 * 1024, 2 * vmem_est)))

    flops = 2 * M * dim * proj_out + 2 * M * inner * dim_out
    bytes_accessed = (M_pad * dim * xbytes
                      + (w1.size + b1.size) * wbytes
                      + (w2.size + b2.size) * wbytes
                      + M_pad * dop * xbytes)
    cost = pl.CostEstimate(flops=flops, transcendentals=M * inner,
                           bytes_accessed=bytes_accessed)

    kernel = functools.partial(_ffn_kernel, glu=glu)

    out2d = pl.pallas_call(
        kernel,
        out_shape=jax.ShapeDtypeStruct((M_pad, dop), x.dtype),
        grid_spec=pltpu.PrefetchScalarGridSpec(
            num_scalar_prefetch=0,
            grid=grid,
            in_specs=([pl.BlockSpec((tm_eff, dim), lambda i, j: (i, 0))]
                      + proj_specs
                      + [pl.BlockSpec((tn_eff, dop), lambda i, j: (j, 0)),
                         pl.BlockSpec((1, dop), lambda i, j: (0, 0))]),
            out_specs=pl.BlockSpec((tm_eff, dop), lambda i, j: (i, 0)),
            scratch_shapes=[pltpu.VMEM((tm_eff, dop), jnp.float32)],
        ),
        compiler_params=pltpu.CompilerParams(
            dimension_semantics=("parallel", "arbitrary"),
            vmem_limit_bytes=vmem_limit),
        cost_estimate=cost,
    )(x2d, *proj_args, w2, b2)

    return out2d[:M, :dim_out].reshape(B, S, dim_out)


def init_params(key, dim, dim_out=None, mult=4, glu=False, dtype=jnp.float32):
    """Synthetic params matching torch.nn.Linear shapes, stored as [in, out]."""
    inner = int(dim * mult)
    dim_out = dim_out or dim
    proj_out = inner * 2 if glu else inner
    k1, k2, k3, k4 = jax.random.split(key, 4)
    lim1 = 1.0 / math.sqrt(dim)
    lim2 = 1.0 / math.sqrt(inner)
    w1 = jax.random.uniform(k1, (dim, proj_out), dtype, -lim1, lim1)
    b1 = jax.random.uniform(k2, (1, proj_out), dtype, -lim1, lim1)
    w2 = jax.random.uniform(k3, (inner, dim_out), dtype, -lim2, lim2)
    b2 = jax.random.uniform(k4, (1, dim_out), dtype, -lim2, lim2)
    return (w1, b1, w2, b2)


def feed_forward_ref(x, params, *, glu=False):
    """Plain-JAX reference for correctness."""
    w1, b1, w2, b2 = params
    h = x @ w1 + b1[0]
    if glu:
        inner = w2.shape[0]
        h = h[..., :inner] * jax.nn.gelu(h[..., inner:], approximate=False)
    else:
        h = jax.nn.gelu(h, approximate=False)
    return h @ w2 + b2[0]


if __name__ == "__main__":
    key = jax.random.PRNGKey(0)
    kx, kp1, kp2 = jax.random.split(key, 3)

    B, S, dim = 2, 8, 32        # small shapes: batch=2, seq=8, hidden=32
    mult = 4

    x = jax.random.normal(kx, (B, S, dim), jnp.float32)

    # glu=False (FeedForward default)
    params = init_params(kp1, dim, mult=mult, glu=False)
    out = jax.block_until_ready(feed_forward(x, params, glu=False))
    ref = feed_forward_ref(x, params, glu=False)
    assert out.shape == (B, S, dim), out.shape
    assert jnp.allclose(out, ref, atol=1e-4, rtol=1e-4), float(
        jnp.max(jnp.abs(out - ref)))

    # glu=True (GEGLU branch)
    params_g = init_params(kp2, dim, mult=mult, glu=True)
    out_g = jax.block_until_ready(feed_forward(x, params_g, glu=True))
    ref_g = feed_forward_ref(x, params_g, glu=True)
    assert out_g.shape == (B, S, dim), out_g.shape
    assert jnp.allclose(out_g, ref_g, atol=1e-4, rtol=1e-4), float(
        jnp.max(jnp.abs(out_g - ref_g)))

    print("KERNEL_OK")
</pallas_src>

<mosaic_0001>
module attributes {stable_mosaic.version = 11 : i64} {
  func.func @_ffn_kernel(%arg0: i32, %arg1: i32, %arg2: memref<16x32xf32, #tpu.memory_space<vmem>>, %arg3: memref<32x128xf32, #tpu.memory_space<vmem>>, %arg4: memref<1x128xf32, #tpu.memory_space<vmem>>, %arg5: memref<128x128xf32, #tpu.memory_space<vmem>>, %arg6: memref<1x128xf32, #tpu.memory_space<vmem>>, %arg7: memref<16x128xf32, #tpu.memory_space<vmem>>, %arg8: memref<16x128xf32, #tpu.memory_space<vmem>>) attributes {dimension_semantics = [#tpu.dimension_semantics<parallel>, #tpu.dimension_semantics<arbitrary>], iteration_bounds = array<i64: 1, 1>, scalar_prefetch = 0 : i64, scratch_operands = 1 : i64, tpu.core_type = #tpu.core_type<tc>, window_params = [{transform_indices = @transform_0, window_bounds = array<i64: 16, 32>}, {transform_indices = @transform_1, window_bounds = array<i64: 32, 128>}, {transform_indices = @transform_2, window_bounds = array<i64: 1, 128>}, {transform_indices = @transform_3, window_bounds = array<i64: 128, 128>}, {pipeline_mode = #tpu.pipeline_mode<synchronous>, transform_indices = @transform_4, window_bounds = array<i64: 1, 128>}, {transform_indices = @transform_5, window_bounds = array<i64: 16, 128>}]} {
    %c0_i32 = arith.constant 0 : i32
    %0 = arith.cmpi eq, %arg1, %c0_i32 : i32
    %1 = arith.extui %0 : i1 to i32
    %c0_i32_0 = arith.constant 0 : i32
    %2 = arith.cmpi ne, %1, %c0_i32_0 : i32
    scf.if %2 {
      %cst_18 = arith.constant 0.000000e+00 : f32
      %25 = vector.broadcast %cst_18 : f32 to vector<16x128xf32>
      %c0_19 = arith.constant 0 : index
      %c0_20 = arith.constant 0 : index
      %26 = vector.load %arg8[%c0_19, %c0_20] : memref<16x128xf32, #tpu.memory_space<vmem>>, vector<16x128xf32>
      tpu.vector_store %arg8[%c0_19, %c0_20], %25 {strides = array<i32>} : memref<16x128xf32, #tpu.memory_space<vmem>>, vector<16x128xf32>,
    } else {
    }
    %c0 = arith.constant 0 : index
    %c0_1 = arith.constant 0 : index
    %3 = vector.load %arg2[%c0, %c0_1] : memref<16x32xf32, #tpu.memory_space<vmem>>, vector<16x32xf32>
    %c0_2 = arith.constant 0 : index
    %c0_3 = arith.constant 0 : index
    %4 = vector.load %arg3[%c0_2, %c0_3] : memref<32x128xf32, #tpu.memory_space<vmem>>, vector<32x128xf32>
    %cst = arith.constant dense<0.000000e+00> : vector<16x128xf32>
    %5 = tpu.matmul %3, %4, %cst {dimension_numbers = #tpu.dot_dimension_numbers<[1], [0], [0], [1], [0, 0, 1, 1], [], []>} : vector<16x32xf32>, vector<32x128xf32>, vector<16x128xf32> -> vector<16x128xf32>
    %c0_4 = arith.constant 0 : index
    %c0_5 = arith.constant 0 : index
    %6 = vector.load %arg4[%c0_4, %c0_5] : memref<1x128xf32, #tpu.memory_space<vmem>>, vector<1x128xf32>
    %7 = vector.broadcast %6 : vector<1x128xf32> to vector<16x128xf32>
    %8 = arith.addf %5, %7 : vector<16x128xf32>
    %cst_6 = arith.constant 5.000000e-01 : f32
    %9 = vector.broadcast %cst_6 : f32 to vector<16x128xf32>
    %10 = arith.mulf %9, %8 : vector<16x128xf32>
    %cst_7 = arith.constant 0.707106769 : f32
    %11 = vector.broadcast %cst_7 : f32 to vector<16x128xf32>
    %12 = arith.mulf %8, %11 : vector<16x128xf32>
    %13 = math.erf %12 : vector<16x128xf32>
    %cst_8 = arith.constant 1.000000e+00 : f32
    %14 = vector.broadcast %cst_8 : f32 to vector<16x128xf32>
    %15 = arith.addf %14, %13 : vector<16x128xf32>
    %16 = arith.mulf %10, %15 : vector<16x128xf32>
    %c0_9 = arith.constant 0 : index
    %c0_10 = arith.constant 0 : index
    %17 = vector.load %arg8[%c0_9, %c0_10] : memref<16x128xf32, #tpu.memory_space<vmem>>, vector<16x128xf32>
    %c0_11 = arith.constant 0 : index
    %c0_12 = arith.constant 0 : index
    %18 = vector.load %arg5[%c0_11, %c0_12] : memref<128x128xf32, #tpu.memory_space<vmem>>, vector<128x128xf32>
    %cst_13 = arith.constant dense<0.000000e+00> : vector<16x128xf32>
    %19 = tpu.matmul %16, %18, %cst_13 {dimension_numbers = #tpu.dot_dimension_numbers<[1], [0], [0], [1], [0, 0, 1, 1], [], []>} : vector<16x128xf32>, vector<128x128xf32>, vector<16x128xf32> -> vector<16x128xf32>
    %20 = arith.addf %17, %19 : vector<16x128xf32>
    %c0_14 = arith.constant 0 : index
    %c0_15 = arith.constant 0 : index
    %21 = vector.load %arg8[%c0_14, %c0_15] : memref<16x128xf32, #tpu.memory_space<vmem>>, vector<16x128xf32>
    tpu.vector_store %arg8[%c0_14, %c0_15], %20 {strides = array<i32>} : memref<16x128xf32, #tpu.memory_space<vmem>>, vector<16x128xf32>,
    %c0_i32_16 = arith.constant 0 : i32
    %22 = arith.cmpi eq, %arg1, %c0_i32_16 : i32
    %23 = arith.extui %22 : i1 to i32
    %c0_i32_17 = arith.constant 0 : i32
    %24 = arith.cmpi ne, %23, %c0_i32_17 : i32
    scf.if %24 {
      %c0_18 = arith.constant 0 : index
      %c0_19 = arith.constant 0 : index
      %25 = vector.load %arg8[%c0_18, %c0_19] : memref<16x128xf32, #tpu.memory_space<vmem>>, vector<16x128xf32>
      %c0_20 = arith.constant 0 : index
      %c0_21 = arith.constant 0 : index
      %26 = vector.load %arg6[%c0_20, %c0_21] : memref<1x128xf32, #tpu.memory_space<vmem>>, vector<1x128xf32>
      %27 = vector.broadcast %26 : vector<1x128xf32> to vector<16x128xf32>
      %28 = arith.addf %25, %27 : vector<16x128xf32>
      %c0_22 = arith.constant 0 : index
      %c0_23 = arith.constant 0 : index
      %29 = vector.load %arg7[%c0_22, %c0_23] : memref<16x128xf32, #tpu.memory_space<vmem>>, vector<16x128xf32>
      tpu.vector_store %arg7[%c0_22, %c0_23], %28 {strides = array<i32>} : memref<16x128xf32, #tpu.memory_space<vmem>>, vector<16x128xf32>,
    } else {
    }
    return
  }
  func.func @transform_0(%arg0: i32, %arg1: i32) -> (i32, i32) {
    %c0_i32 = arith.constant 0 : i32
    %c0_i32_0 = arith.constant 0 : i32
    return %arg0, %c0_i32 : i32, i32
  }
  func.func @transform_1(%arg0: i32, %arg1: i32) -> (i32, i32) {
    %c0_i32 = arith.constant 0 : i32
    %c0_i32_0 = arith.constant 0 : i32
    return %c0_i32, %arg1 : i32, i32
  }
  func.func @transform_2(%arg0: i32, %arg1: i32) -> (i32, i32) {
    %c0_i32 = arith.constant 0 : i32
    %c0_i32_0 = arith.constant 0 : i32
    return %c0_i32, %arg1 : i32, i32
  }
  func.func @transform_3(%arg0: i32, %arg1: i32) -> (i32, i32) {
    %c0_i32 = arith.constant 0 : i32
    %c0_i32_0 = arith.constant 0 : i32
    return %arg1, %c0_i32 : i32, i32
  }
  func.func @transform_4(%arg0: i32, %arg1: i32) -> (i32, i32) {
    %c0_i32 = arith.constant 0 : i32
    %c0_i32_0 = arith.constant 0 : i32
    %c0_i32_1 = arith.constant 0 : i32
    return %c0_i32, %c0_i32_0 : i32, i32
  }
  func.func @transform_5(%arg0: i32, %arg1: i32) -> (i32, i32) {
    %c0_i32 = arith.constant 0 : i32
    %c0_i32_0 = arith.constant 0 : i32
    return %arg0, %c0_i32 : i32, i32
  }
}

</mosaic_0001>

<bundles_post_ra>
// kernel: tpu_custom_call.1
= control target key start
LH: loop header
LB: loop body
LE: loop exit
PB: predicated region body
PF: predicated region fallthrough
CT: control target
= control target key end

     0   :  { %10 = vsyncpa [#allocation4], 0  ;;  %s510_s0 = inlined_call_operand.hbm [shape: f32[16,32], index: 0, kind: input, shape index: {}]   ;;  %s511_s1 = inlined_call_operand.hbm [shape: f32[32,128], index: 1, kind: input, shape index: {}]   ;;  %s512_s2 = inlined_call_operand.vmem [shape: f32[1,128], index: 2, kind: input, shape index: {}]   ;;  %s513_s3 = inlined_call_operand.hbm [shape: f32[128,128], index: 3, kind: input, shape index: {}]   ;;  %s514_s4 = inlined_call_operand.vmem [shape: f32[1,128], index: 4, kind: input, shape index: {}]   ;;  %s515_s5 = inlined_call_operand.hbm [shape: f32[16,128], index: 5, kind: output, shape index: {}]  }
   0x1   :  { %11 = vsyncpa [#allocation7], 0 }
   0x2   :  { %12 = vsyncpa [#allocation5], 0  ;;  %s30_s20 = sshll.u32 %s511_s1, 4  ;;  %s414_s21 = smov [#allocation6]   ;;  %s31_s20 = int_to_ptr.hbm [resolvable:$true] %s30_s20 }
   0x3   :  { %s32_s22 = sshll.u32 %s414_s21, 4  ;;  %s17_s25 = sshll.u32 %s510_s0, 4  ;;  %s33_s22 = int_to_ptr.vmem [resolvable:$true] %s32_s22  ;;  %s18_s25 = int_to_ptr.hbm [resolvable:$true] %s17_s25 }
   0x4   :  { %s415_s26 = smov 128   ;;  %s416_s27 = smov 8  }
   0x5   :  { %38 = dma.hbm_to_vmem [thread:$0]  %s31_s20, 512, %s33_s22, [#allocation7], %s415_s26, %s415_s26, %s416_s27  }
   0x6   :  { %s417_s28 = smov [#allocation3]   ;;  %s45_s1 = sshll.u32 %s513_s3, 4  ;;  %s46_s1 = int_to_ptr.hbm [resolvable:$true] %s45_s1 }
   0x7   :  { %s19_s29 = sshll.u32 %s417_s28, 4  ;;  %s418_s0 = smov [#allocation8]   ;;  %s20_s29 = int_to_ptr.vmem [resolvable:$true] %s19_s29 }
   0x8   :  { %25 = dma.hbm_to_vmem [thread:$0]  %s18_s25, 256, %s20_s29, [#allocation4], %s415_s26, %s415_s26, %s416_s27  }
   0x9   :  { %s47_s7 = sshll.u32 %s418_s0, 4  ;;  %s48_s7 = int_to_ptr.vmem [resolvable:$true] %s47_s7 }
   0xa   :  { %53 = dma.hbm_to_vmem [thread:$0]  %s46_s1, 2048, %s48_s7, [#allocation7], %s415_s26, %s415_s26, %s416_s27  }
   0xb   :  { %408 = dma.done.wait [#allocation4], 256  }
   0xc   :  { %409 = vsyncadd [#allocation4], 4294967040 }
   0xd   :  { %410 = dma.done.wait [#allocation7], 2560  }
   0xe   :  { %411 = vsyncadd [#allocation7], 4294964736  ;;  %v79_v0 = vld [vmem:[#allocation6 + $0x18] sm:$0xff]  ;;  %v78_v1 = vld [vmem:[#allocation6 + $0x10] sm:$0xff]  ;;  %vm84_vm0 = vcmask 261120   ;;  %s419_s10 = smov [#allocation9]  }
   0xf   :  { %103 = vmatpush.msra.mxu0 %v79_v0  ;;  %v77_v2 = vld [vmem:[#allocation6 + $0x8] sm:$0xff]  ;;  %v76_v3 = vld [vmem:[#allocation6] sm:$0xff]  ;;  %v74_v4 = vld [vmem:[#allocation3] sm:$0xff]  ;;  %s264_s11 = sshll.u32 %s419_s10, 4  ;;  %s266_s14 = sshll.u32 %s515_s5, 4  ;;  %s265_s11 = int_to_ptr.vmem [resolvable:$true] %s264_s11  ;;  %s267_s14 = int_to_ptr.hbm [resolvable:$true] %s266_s14 }
  0x10   :  { %v75_v5 = vld [vmem:[#allocation3 + $0x8] sm:$0xff]  ;;  %v218_v7 = vld [vmem:[#allocation8 + $0x70] sm:$0xff]  ;;  %v217_v8 = vld [vmem:[#allocation8 + $0x68] sm:$0xff] }
  0x11   :  { %104 = vmatpush.msra.mxu0 %v78_v1  ;;  %v219_v6 = vld [vmem:[#allocation8 + $0x78] sm:$0xff]  ;;  %v216_v9 = vld [vmem:[#allocation8 + $0x60] sm:$0xff]  ;;  %v306_v10 = vld [vmem:[%s512_s2] ss:$0 sm:$0xff] }
  0x12   :  { %220 = vmatpush.msra.mxu1 %v219_v6  ;;  %284 = vmatpush.msra.mxu2 %v219_v6  ;;  %v215_v11 = vld [vmem:[#allocation8 + $0x58] sm:$0xff]  ;;  %v214_v13 = vld [vmem:[#allocation8 + $0x50] sm:$0xff]  ;;  %v213_v15 = vld [vmem:[#allocation8 + $0x48] sm:$0xff] }
  0x13   :  { %105 = vmatpush.msra.mxu0 %v77_v2  ;;  %v212_v17 = vld [vmem:[#allocation8 + $0x40] sm:$0xff]  ;;  %v211_v19 = vld [vmem:[#allocation8 + $0x38] sm:$0xff]  ;;  %v210_v20 = vld [vmem:[#allocation8 + $0x30] sm:$0xff] }
  0x14   :  { %221 = vmatpush.msra.mxu1 %v218_v7  ;;  %285 = vmatpush.msra.mxu2 %v218_v7  ;;  %v209_v23 = vld [vmem:[#allocation8 + $0x28] sm:$0xff]  ;;  %v208_v27 = vld [vmem:[#allocation8 + $0x20] sm:$0xff]  ;;  %v207_v30 = vld [vmem:[#allocation8 + $0x18] sm:$0xff] }
  0x15   :  { %106 = vmatpush.msra.mxu0 %v76_v3  ;;  %v206_v34 = vld [vmem:[#allocation8 + $0x10] sm:$0xff]  ;;  %v205_v37 = vld [vmem:[#allocation8 + $0x8] sm:$0xff]  ;;  %v204_v42 = vld [vmem:[#allocation8] sm:$0xff] }
  0x16   :  { %280 = vmatmul.msk.f32.vlgmr.msra.gmra.mxu0 %vm84_vm0, %v74_v4  ;;  %222 = vmatpush.msra.mxu1 %v217_v8 }
  0x17   :  { %286 = vmatpush.msra.mxu2 %v217_v8 }
  0x18   :  { %223 = vmatpush.msra.mxu1 %v216_v9 }
  0x19   :  { %287 = vmatpush.msra.mxu2 %v216_v9 }
  0x1a   :  { %224 = vmatpush.msra.mxu1 %v215_v11 }
  0x1b   :  { %288 = vmatpush.msra.mxu2 %v215_v11 }
  0x1c   :  { %225 = vmatpush.msra.mxu1 %v214_v13 }
  0x1d   :  { %289 = vmatpush.msra.mxu2 %v214_v13 }
  0x1e   :  { %281 = vmatmul.msk.f32.gmra.mxu0 %vm84_vm0, %v75_v5  ;;  %226 = vmatpush.msra.mxu1 %v213_v15 }
  0x1f   :  { %290 = vmatpush.msra.mxu2 %v213_v15 }
  0x20   :  { %227 = vmatpush.msra.mxu1 %v212_v17 }
  0x21   :  { %291 = vmatpush.msra.mxu2 %v212_v17 }
  0x22   :  { %228 = vmatpush.msra.mxu1 %v211_v19 }
  0x23   :  { %292 = vmatpush.msra.mxu2 %v211_v19 }
  0x24   :  { %229 = vmatpush.msra.mxu1 %v210_v20 }
  0x25   :  { %293 = vmatpush.msra.mxu2 %v210_v20 }
  0x26   :  { %230 = vmatpush.msra.mxu1 %v209_v23 }
  0x27   :  { %294 = vmatpush.msra.mxu2 %v209_v23 }
  0x28   :  { %231 = vmatpush.msra.mxu1 %v208_v27 }
  0x29   :  { %295 = vmatpush.msra.mxu2 %v208_v27 }
  0x2a   :  { %232 = vmatpush.msra.mxu1 %v207_v30 }
  0x2b   :  { %296 = vmatpush.msra.mxu2 %v207_v30 }
  0x2c   :  { %233 = vmatpush.msra.mxu1 %v206_v34 }
  0x2d   :  { %297 = vmatpush.msra.mxu2 %v206_v34 }
  0x2e   :  { %234 = vmatpush.msra.mxu1 %v205_v37 }
  0x2f   :  { %298 = vmatpush.msra.mxu2 %v205_v37 }
  0x30   :  { %235 = vmatpush.msra.mxu1 %v204_v42 }
  0x31   :  { %299 = vmatpush.msra.mxu2 %v204_v42 }
  0x93   :  { %v108_v12 = vpop.f32.mrf.mxu0 }
  0x94   :  { %v471_v14 = vadd.f32 %v306_v10, %v108_v12 }
  0x96   :  { %v474_v16 = vmul.f32 0.70710677, %v471_v14 }
  0x98   :  { %v118_v18 = vmul.f32 %v474_v16, %v474_v16 }
  0x9a   :  { %v478_v21 = vmin.f32 %v118_v18, 16.0 }
  0x9b   :  { %v111_v22 = vpop.f32.mrf.mxu0 }
  0x9c   :  { %v120_v24 = vmul.f32 2.1237322e-06, %v478_v21  ;;  %v481_v25 = vadd.f32 %v306_v10, %v111_v22  ;;  %v131_v26 = vmul.f32 3.8918573e-05, %v478_v21 }
  0x9e   :  { %v121_v28 = vadd.f32 0.00028619796, %v120_v24  ;;  %v485_v29 = vmul.f32 0.70710677, %v481_v25  ;;  %v132_v31 = vadd.f32 0.001143296, %v131_v26 }
  0xa0   :  { %v122_v32 = vmul.f32 %v121_v28, %v478_v21  ;;  %v158_v33 = vmul.f32 %v485_v29, %v485_v29  ;;  %v133_v35 = vmul.f32 %v132_v31, %v478_v21 }
  0xa2   :  { %v159_v36 = vmin.f32 %v158_v33, 16.0  ;;  %v134_v38 = vadd.f32 0.014752088, %v133_v35  ;;  %v123_v39 = vadd.f32 0.0036580483, %v122_v32  ;;  %v114_v33 = vmul.f32 0.5, %v471_v14 }
  0xa3   :  { %v307_v14 = vld [vmem:[%s514_s4] ss:$0 sm:$0xff] }
  0xa4   :  { %v160_v40 = vmul.f32 2.1237322e-06, %v159_v36  ;;  %v171_v41 = vmul.f32 3.8918573e-05, %v159_v36  ;;  %v135_v43 = vmul.f32 %v134_v38, %v478_v21  ;;  %v124_v47 = vmul.f32 %v123_v39, %v478_v21 }
  0xa6   :  { %v161_v44 = vadd.f32 0.00028619796, %v160_v40  ;;  %v172_v45 = vadd.f32 0.001143296, %v171_v41  ;;  %v136_v46 = vadd.f32 0.112945676, %v135_v43 }
  0xa7   :  { %v125_v54 = vadd.f32 0.05243302, %v124_v47  ;;  %v115_v41 = vmul.f32 0.5, %v481_v25 }
  0xa8   :  { %v162_v48 = vmul.f32 %v161_v44, %v159_v36  ;;  %v173_v49 = vmul.f32 %v172_v45, %v159_v36  ;;  %v137_v50 = vmul.f32 %v136_v46, %v478_v21 }
  0xa9   :  { %v126_v60 = vmul.f32 %v125_v54, %v478_v21 }
  0xaa   :  { %v174_v51 = vadd.f32 0.014752088, %v173_v49  ;;  %v163_v52 = vadd.f32 0.0036580483, %v162_v48  ;;  %v138_v53 = vadd.f32 0.4994258, %v137_v50 }
  0xab   :  { %v127_v0 = vadd.f32 0.18741608, %v126_v60 }
  0xac   :  { %v175_v55 = vmul.f32 %v174_v51, %v159_v36  ;;  %v139_v56 = vmul.f32 %v138_v53, %v478_v21  ;;  %v164_v58 = vmul.f32 %v163_v52, %v159_v36 }
  0xad   :  { %v128_v5 = vmul.f32 %v127_v0, %v478_v21 }
  0xae   :  { %v176_v57 = vadd.f32 0.112945676, %v175_v55  ;;  %v140_v59 = vadd.f32 1.0, %v139_v56  ;;  %v165_v63 = vadd.f32 0.05243302, %v164_v58 }
  0xaf   :  { %v129_v10 = vadd.f32 1.1283791, %v128_v5 }
  0xb0   :  { %v177_v61 = vmul.f32 %v176_v57, %v159_v36  ;;  %308 = vrcp.f32 %v140_v59  ;;  %v166_v4 = vmul.f32 %v165_v63, %v159_v36  ;;  %v152_v9 = vand.u32 2147483648, %v140_v59 }
  0xb1   :  { %v150_v12 = vand.u32 2147483647, %v140_v59  ;;  %vm146_vm2 = vweird.f32 %v140_v59  ;;  %v130_v20 = vmul.f32 %v129_v10, %v474_v16 }
  0xb2   :  { %v178_v62 = vadd.f32 0.4994258, %v177_v61  ;;  %v167_v8 = vadd.f32 0.18741608, %v166_v4  ;;  %v153_v18 = vor.u32 1.1754944e-38, %v152_v9 }
  0xb3   :  { %vm151_vm4 = vcmp.eq.f32.partialorder %v150_v12, 8.507059e+37 }
  0xb4   :  { %v179_v1 = vmul.f32 %v178_v62, %v159_v36  ;;  %v168_v17 = vmul.f32 %v167_v8, %v159_v36 }
  0xb6   :  { %v180_v2 = vadd.f32 1.0, %v179_v1  ;;  %v309_v3 = vpop.eup %308  ;;  %v169_v27 = vadd.f32 1.1283791, %v168_v17 }
  0xb7   :  { %v142_v6 = vmul.f32 %v309_v3, %v140_v59  ;;  %vm147_vm1 = vweird.f32 %v309_v3 }
  0xb8   :  { %310 = vrcp.f32 %v180_v2  ;;  %vm148_vm3 = vmor %vm146_vm2, %vm147_vm1  ;;  %v192_v26 = vand.u32 2147483648, %v180_v2  ;;  %v190_v30 = vand.u32 2147483647, %v180_v2  ;;  %vm186_vm6 = vweird.f32 %v180_v2 }
  0xb9   :  { %v143_v7 = vsub.f32 1.0, %v142_v6  ;;  %v170_v16 = vmul.f32 %v169_v27, %v485_v29 }
  0xba   :  { %v193_v35 = vor.u32 1.1754944e-38, %v192_v26  ;;  %vm191_vm8 = vcmp.eq.f32.partialorder %v190_v30, 8.507059e+37 }
  0xbb   :  { %v144_v11 = vmul.f32 %v309_v3, %v143_v7 }
  0xbd   :  { %v145_v15 = vadd.f32 %v309_v3, %v144_v11 }
  0xbe   :  { %v311_v13 = vpop.eup %310 }
  0xbf   :  { %v182_v19 = vmul.f32 %v311_v13, %v180_v2  ;;  %v149_v22 = vsel %vm148_vm3, %v309_v3, %v145_v15  ;;  %vm187_vm5 = vweird.f32 %v311_v13 }
  0xc0   :  { %v154_v21 = vsel %vm151_vm4, %v153_v18, %v149_v22  ;;  %vm188_vm7 = vmor %vm186_vm6, %vm187_vm5 }
  0xc1   :  { %v183_v23 = vsub.f32 1.0, %v182_v19  ;;  %v155_v24 = vmul.f32 %v154_v21, %v130_v20 }
  0xc3   :  { %v184_v28 = vmul.f32 %v311_v13, %v183_v23  ;;  %v282_v31 = vclamps-f32 %v155_v24, 1.0 }
  0xc5   :  { %v185_v32 = vadd.f32 %v311_v13, %v184_v28  ;;  %v198_v34 = vadd.f32 1.0, %v282_v31 }
  0xc7   :  { %v189_v36 = vsel %vm188_vm7, %v311_v13, %v185_v32  ;;  %v200_v37 = vmul.f32 %v198_v34, %v114_v33 }
  0xc8   :  { %v194_v38 = vsel %vm191_vm8, %v193_v35, %v189_v36 }
  0xc9   :  { %v195_v39 = vmul.f32 %v194_v38, %v170_v16  ;;  %236 = vmatmul.f32.vlgmr.msra.gmra.mxu1 %v200_v37 }
  0xcb   :  { %v283_v40 = vclamps-f32 %v195_v39, 1.0 }
  0xcd   :  { %v199_v42 = vadd.f32 1.0, %v283_v40 }
  0xcf   :  { %v201_v43 = vmul.f32 %v199_v42, %v115_v41 }
  0xd1   :  { %239 = vmatmul.f32.vlgmr.msra.gmra.mxu2 %v201_v43 }
 0x146   :  { %v237_v44 = vpop.f32.mrf.mxu1 }
 0x147   :  { %v256_v45 = vadd.f32 %v307_v14, %v237_v44 }
 0x149   :  { %258 = vst [vmem:[#allocation9] sm:$0xff] %v256_v45 }
 0x154   :  { %v240_v29 = vpop.f32.mrf.mxu2 }
 0x155   :  { %v257_v46 = vadd.f32 %v307_v14, %v240_v29 }
 0x157   :  { %259 = vst [vmem:[#allocation9 + $0x8] sm:$0xff] %v257_v46 }
 0x158   :  { %272 = dma.vmem_to_hbm [thread:$0]  %s265_s11, 256, %s267_s14, [#allocation5], %s415_s26, %s415_s26, %s416_s27  }
 0x159   :  { %412 = dma.done.wait [#allocation5], 256  }
 0x15a   :  { %413 = vsyncadd [#allocation5], 4294967040 }
 0x15b   :  { %277 = vsyncpa [#allocation4], 1 }
 0x15c   :  { %278 = vsyncpa [#allocation7], 1 }
 0x15d   :  { %279 = vsyncpa [#allocation5], 1 }

</bundles_post_ra>
